<compile_context>
chip_gen: v5e
topology: v5e:2x2
jax: 0.10.0
libtpu: 0.0.40
codegen_flags: <defaults>
</compile_context>

<pallas_src>
import functools

import numpy as np
import jax
import jax.numpy as jnp
from jax import lax
from jax.experimental import pallas as pl
from jax.experimental.pallas import tpu as pltpu

# ---- module hyper-parameters (hard-coded in the PyTorch module) -------------
GRAPH_EMB = 128      # graph_emb_size  (must equal hidden_size for the concat)
INFL_EMB = 128       # influence_emb_size (must equal MHA embed_dim)
HIDDEN = 128         # self.hidden_size
GRU_H = 64           # self.output_size (GRU hidden per direction)
MLP_HID = 64
MLP_OUT = 32
NUM_HEADS = 2
N_QUERY = 5


def _round_up(x, m):
    return ((x + m - 1) // m) * m


def _pick_tile(n, max_tile):
    """Tile: multiple of 8, <= max_tile, and (when possible) >=2 grid steps so a
    'parallel' grid axis can shard across the two v7x TensorCores."""
    t = max(8, min(max_tile, _round_up(n, 8)))
    if _round_up(n, t) // t < 2 and n > 8:
        t = max(8, _round_up((n + 1) // 2, 8))
    return t


def _largest_divisor_tile(n, max_tile, multiple=8):
    """Largest multiple-of-8 divisor of n that is <= max_tile (n % 8 == 0)."""
    t = min(max_tile, n)
    t -= t % multiple
    while t > multiple:
        if n % t == 0:
            return t
        t -= multiple
    return multiple


def _vmem_capacity_bytes():
    try:
        cap = int(pltpu.get_tpu_info().vmem_capacity_bytes)
        if cap > 0:
            return cap
    except Exception:
        pass
    return 128 * 1024 * 1024


def _kernel2_vmem_plan(lmax, n_seq):
    """Generation-aware sequence tile + scoped-VMEM limit for the GRU kernel."""
    cap = _vmem_capacity_bytes()
    budget = max(8 * 2**20, cap // 2 - 8 * 2**20)   # ~56 MiB on 128-MiB parts, ~24 MiB on v7x
    # per-sequence VMEM: double-buffered bf16 gate block + double-buffered f32 output
    per_seq = lmax * 6 * GRU_H * 2 * 2 + 2 * GRU_H * 4 * 2 + 64
    ts_cap = max(8, (budget // max(per_seq, 1)) // 8 * 8)
    ts = _pick_tile(n_seq, min(256, ts_cap))
    vmem_limit = int(min(cap - 4 * 2**20, max(32 * 2**20, cap * 3 // 4)))
    return ts, vmem_limit


def _fuse_gate_cols(f, b, h):
    """Interleave fwd/bwd gate column blocks -> [r_f r_b z_f z_b n_f n_b]."""
    return jnp.concatenate(
        [f[..., 0:h], b[..., 0:h],
         f[..., h:2 * h], b[..., h:2 * h],
         f[..., 2 * h:3 * h], b[..., 2 * h:3 * h]], axis=-1)


# =============================================================================
# Kernel 1: Linear(128,64)+ReLU with the second MLP layer folded into the fused
#           GRU input projections -> bf16 (rows, 384) gate stream.
# =============================================================================
def mlp_gates_kernel(x_ref, w1_ref, b1_ref, wg_ref, bg_ref, o_ref):
    x = x_ref[...]                                                    # (tm, D) bf16
    h = jnp.dot(x, w1_ref[...], preferred_element_type=jnp.float32) + b1_ref[...]
    h = jnp.maximum(h, 0.0).astype(jnp.bfloat16)                      # (tm, 64)
    g = jnp.dot(h, wg_ref[...], preferred_element_type=jnp.float32) + bg_ref[...]
    o_ref[...] = g.astype(jnp.bfloat16)                               # (tm, 384)


def mlp_gates_forward(x_bf16, w1_bf16, b1, wg_bf16, bg, tm):
    rows, d = x_bf16.shape
    ncols = wg_bf16.shape[1]
    return pl.pallas_call(
        mlp_gates_kernel,
        out_shape=jax.ShapeDtypeStruct((rows, ncols), jnp.bfloat16),
        grid=(rows // tm,),
        in_specs=[
            pl.BlockSpec((tm, d), lambda i: (i, 0)),
            pl.BlockSpec(w1_bf16.shape, lambda i: (0, 0)),
            pl.BlockSpec(b1.shape, lambda i: (0, 0)),
            pl.BlockSpec(wg_bf16.shape, lambda i: (0, 0)),
            pl.BlockSpec(bg.shape, lambda i: (0, 0)),
        ],
        out_specs=pl.BlockSpec((tm, ncols), lambda i: (i, 0)),
        compiler_params=pltpu.CompilerParams(dimension_semantics=("parallel",)),
    )(x_bf16, w1_bf16, b1, wg_bf16, bg)


# =============================================================================
# Kernel 2: bidirectional GRU recurrence.  Input gates are precomputed (kernel 1)
#           and stored time-major; the backward direction indexes time lmax-1-t
#           inside the loop (no reversed copy).  One fused recurrent matmul/step.
# =============================================================================
def bigru_kernel(gi_ref, len_ref, wh_ref, bh_ref, o_ref, *, hidden):
    lmax, ts, g = gi_ref.shape
    H = hidden
    H2 = 2 * H
    lens = len_ref[...]                                               # (ts, 1) int32
    wh = wh_ref[...]                                                  # (128, 384) bf16
    bh = bh_ref[...]                                                  # (1, 384) f32

    gate_lane = lax.broadcasted_iota(jnp.int32, (ts, g), 1)
    fwd_gate = (gate_lane // H) % 2 == 0          # forward-direction gate columns
    out_lane = lax.broadcasted_iota(jnp.int32, (ts, H2), 1)
    fwd_half = out_lane < H                       # forward half of the hidden state

    def step(t, h):
        gi_t = gi_ref[t].astype(jnp.float32)              # gates at time t (fwd)
        gi_r = gi_ref[lmax - 1 - t].astype(jnp.float32)   # gates at reversed time (bwd)
        gi = jnp.where(fwd_gate, gi_t, gi_r)              # [r_f r_b z_f z_b n_f n_b]
        gh = jnp.dot(h.astype(jnp.bfloat16), wh,
                     preferred_element_type=jnp.float32) + bh
        # r,z gates -> lanes [0, 256): two aligned vregs; EUP approx reciprocal.
        rz = pl.reciprocal(1.0 + jnp.exp(-(gi[:, :2 * H2] + gh[:, :2 * H2])),
                           approx=True)
        r = rz[:, :H2]
        z = rz[:, H2:]
        n = jnp.tanh(gi[:, 2 * H2:] + r * gh[:, 2 * H2:])
        h_new = (1.0 - z) * n + z * h
        commit = jnp.where(fwd_half, t < lens, (lmax - 1 - t) < lens)
        return jnp.where(commit, h_new, h)

    h = lax.fori_loop(0, lmax, step, jnp.zeros((ts, H2), jnp.float32))
    # torch.cat([final_state[-1], final_state[-2]], 1) == [backward, forward]
    o_ref[...] = jnp.concatenate([h[:, H:], h[:, :H]], axis=1)


def bigru_forward(gi, lens2, wh_fused, bh_fused, ts, vmem_limit):
    lmax, nseq_p, g = gi.shape
    h2 = wh_fused.shape[0]
    return pl.pallas_call(
        functools.partial(bigru_kernel, hidden=GRU_H),
        out_shape=jax.ShapeDtypeStruct((nseq_p, h2), jnp.float32),
        grid=(nseq_p // ts,),
        in_specs=[
            pl.BlockSpec((lmax, ts, g), lambda s: (0, s, 0)),
            pl.BlockSpec((ts, 1), lambda s: (s, 0)),
            pl.BlockSpec(wh_fused.shape, lambda s: (0, 0)),
            pl.BlockSpec(bh_fused.shape, lambda s: (0, 0)),
        ],
        out_specs=pl.BlockSpec((ts, h2), lambda s: (s, 0)),
        compiler_params=pltpu.CompilerParams(
            dimension_semantics=("parallel",),
            vmem_limit_bytes=vmem_limit),
    )(gi, lens2, wh_fused, bh_fused)


# =============================================================================
# Kernel 3: batched 2-head attention, mean over the 5 query slots before the
#           output projection.  Heads handled with lane masks (no 64-lane
#           offset slices); all streamed operands are bf16.
# =============================================================================
def mha_mean_kernel(q_ref, k_ref, v_ref, wo_ref, bo_ref, o_ref, *, num_heads):
    q = q_ref[...]                                                    # (tb, Lq, E) bf16
    k = k_ref[...]                                                    # (tb, S,  E) bf16
    v = v_ref[...]                                                    # (tb, S,  E) bf16
    e = q.shape[2]
    hd = e // num_heads
    lane = lax.broadcasted_iota(jnp.int32, (1, 1, e), 2)

    ctx = None
    for h in range(num_heads):
        head_mask = (lane >= h * hd) & (lane < (h + 1) * hd)
        qh = jnp.where(head_mask, q, jnp.zeros_like(q))               # zero other head's lanes
        s = jnp.einsum('bqd,bkd->bqk', qh, k,
                       preferred_element_type=jnp.float32)            # (tb, Lq, S)
        s = s - jnp.max(s, axis=-1, keepdims=True)
        p = jnp.exp(s)
        p = p * pl.reciprocal(jnp.sum(p, axis=-1, keepdims=True), approx=True)
        c = jnp.einsum('bqk,bkd->bqd', p.astype(jnp.bfloat16), v,
                       preferred_element_type=jnp.float32)            # full-lane ctx
        ctx = c if ctx is None else jnp.where(head_mask, c, ctx)
    ctx_mean = jnp.mean(ctx, axis=1)                                  # (tb, E)
    o_ref[...] = jnp.dot(ctx_mean.astype(jnp.bfloat16), wo_ref[...],
                         preferred_element_type=jnp.float32) + bo_ref[...]


def mha_forward(q, k_all, v_all, batch, wo_bf16, bo, max_tb=128):
    nb, s, e = k_all.shape
    lq = q.shape[1]
    share_q = (batch % 8 == 0)
    if share_q:
        # q depends only on the batch slot: keep one (B, 5, E) copy in HBM and
        # re-read the same block every year via the index_map (no jnp.tile).
        tb = _largest_divisor_tile(batch, max_tb)
        nb_p = nb
        q_in, k_p, v_p = q, k_all, v_all
        q_blocks = batch // tb
        q_index = lambda n: (n % q_blocks, 0, 0)
    else:
        tb = _pick_tile(nb, max_tb)
        nb_p = _round_up(nb, tb)
        q_in = jnp.tile(q, (nb // batch, 1, 1))
        q_in = jnp.pad(q_in, ((0, nb_p - nb), (0, 0), (0, 0)))
        k_p = jnp.pad(k_all, ((0, nb_p - nb), (0, 0), (0, 0)))
        v_p = jnp.pad(v_all, ((0, nb_p - nb), (0, 0), (0, 0)))
        q_index = lambda n: (n, 0, 0)
    out = pl.pallas_call(
        functools.partial(mha_mean_kernel, num_heads=NUM_HEADS),
        out_shape=jax.ShapeDtypeStruct((nb_p, e), jnp.float32),
        grid=(nb_p // tb,),
        in_specs=[
            pl.BlockSpec((tb, lq, e), q_index),
            pl.BlockSpec((tb, s, e), lambda n: (n, 0, 0)),
            pl.BlockSpec((tb, s, e), lambda n: (n, 0, 0)),
            pl.BlockSpec(wo_bf16.shape, lambda n: (0, 0)),
            pl.BlockSpec(bo.shape, lambda n: (0, 0)),
        ],
        out_specs=pl.BlockSpec((tb, e), lambda n: (n, 0)),
        compiler_params=pltpu.CompilerParams(dimension_semantics=("parallel",)),
    )(q_in, k_p, v_p, wo_bf16, bo)
    return out[:nb]


# =============================================================================
# Pure-JAX references (unfused, f32) used only for the correctness check
# =============================================================================
def mlp_ref(x, w1, b1, w2, b2):
    return jnp.maximum(x @ w1 + b1, 0.0) @ w2 + b2


def bigru_ref(xf, xb, lens2, wif, whf, bif, bhf, wib, whb, bib, bhb):
    lmax, nseq, _ = xf.shape
    H = whf.shape[0]

    def cell(x_t, h, wi, wh, bi, bh):
        gi = x_t @ wi + bi
        gh = h @ wh + bh
        r = 1.0 / (1.0 + jnp.exp(-(gi[:, :H] + gh[:, :H])))
        z = 1.0 / (1.0 + jnp.exp(-(gi[:, H:2 * H] + gh[:, H:2 * H])))
        n = jnp.tanh(gi[:, 2 * H:] + r * gh[:, 2 * H:])
        return (1.0 - z) * n + z * h

    hf = jnp.zeros((nseq, H), jnp.float32)
    hb = jnp.zeros((nseq, H), jnp.float32)
    for t in range(lmax):
        valid = t < lens2
        hf = jnp.where(valid, cell(xf[t], hf, wif, whf, bif, bhf), hf)
        hb = jnp.where(valid, cell(xb[t], hb, wib, whb, bib, bhb), hb)
    return jnp.concatenate([hb, hf], axis=1)


def mha_mean_ref(q_all, kv_all, wq, bq, wk, bk, wv, bv, wo, bo):
    E = q_all.shape[-1]
    hd = E // NUM_HEADS
    Q = q_all @ wq + bq
    K = kv_all @ wk + bk
    V = kv_all @ wv + bv
    outs = []
    for h in range(NUM_HEADS):
        Qh = Q[..., h * hd:(h + 1) * hd] * (1.0 / np.sqrt(hd))
        Kh = K[..., h * hd:(h + 1) * hd]
        Vh = V[..., h * hd:(h + 1) * hd]
        s = jnp.einsum('nqd,nkd->nqk', Qh, Kh)
        p = jax.nn.softmax(s, axis=-1)
        outs.append(jnp.einsum('nqk,nkd->nqd', p, Vh))
    O = jnp.concatenate(outs, axis=-1)
    out = O @ wo + bo
    return jnp.mean(out, axis=1)


# =============================================================================
# Full forward pass (mirrors HDGNN_Influence_Model.forward)
# =============================================================================
def model_forward(params, embeddings, index_list, input_ids, alignment_list,
                  train_year, num_rel, use_pallas=True):
    input_np = np.asarray(input_ids)
    B = int(input_np.shape[0])
    D = embeddings.shape[-1]
    E = INFL_EMB
    H = GRU_H
    S = 1 + num_rel

    # --- host-side glue: variable-length neighbour lists (mirrors .item() loop).
    # Sequence order = (year, batch, rel) so the GRU output reshapes directly to
    # (T, B, R, E) with no XLA transpose before the attention K/V build.
    seqs = []
    for i in range(train_year):
        for b in input_np:
            for j in range(num_rel):
                seqs.append(list(index_list[i][j][int(b)]))
    n_seq = len(seqs)
    lmax = max(max((len(s) for s in seqs), default=0), 1)
    idx = np.zeros((n_seq, lmax), np.int32)
    lens = np.zeros((n_seq,), np.int32)
    for s_i, seq in enumerate(seqs):
        lens[s_i] = len(seq)
        if seq:
            idx[s_i, :len(seq)] = np.asarray(seq, np.int32)
    years = np.arange(n_seq, dtype=np.int32) // (B * num_rel)

    if use_pallas:
        ts, vmem_limit = _kernel2_vmem_plan(lmax, n_seq)
        n_seq_p = _round_up(n_seq, ts)
        pad = n_seq_p - n_seq
        idx_p = np.pad(idx, ((0, pad), (0, 0)))
        lens_p = np.pad(lens, (0, pad))
        years_p = np.pad(years, (0, pad))

        # time-major neighbour gather straight from a bf16 embedding table
        emb_bf16 = embeddings.astype(jnp.bfloat16)
        gathered = emb_bf16[years_p[None, :], idx_p.T, :]             # (lmax, n_seq_p, D)
        x_flat = gathered.reshape(lmax * n_seq_p, D)

        # fold Linear(64,32) into the GRU input projections (no nonlinearity between)
        # and interleave fwd/bwd gate columns -> one fused recurrence matmul per step.
        wgf = params['mlp_w2'] @ params['gru_wif']
        wgb = params['mlp_w2'] @ params['gru_wib']
        bgf = params['mlp_b2'] @ params['gru_wif'] + params['gru_bif']
        bgb = params['mlp_b2'] @ params['gru_wib'] + params['gru_bib']
        w_gates = _fuse_gate_cols(wgf, wgb, H).astype(jnp.bfloat16)   # (64, 384)
        b_gates = _fuse_gate_cols(bgf, bgb, H)                        # (1, 384) f32

        zeros_w = jnp.zeros_like(params['gru_whf'])
        wh_fused = jnp.concatenate(
            [_fuse_gate_cols(params['gru_whf'], zeros_w, H),
             _fuse_gate_cols(zeros_w, params['gru_whb'], H)],
            axis=0).astype(jnp.bfloat16)                              # (128, 384)
        bh_fused = _fuse_gate_cols(params['gru_bhf'], params['gru_bhb'], H)

        tm = _largest_divisor_tile(lmax * n_seq_p, 1024)
        gi = mlp_gates_forward(x_flat, params['mlp_w1'].astype(jnp.bfloat16),
                               params['mlp_b1'], w_gates, b_gates, tm)
        gi = gi.reshape(lmax, n_seq_p, 6 * H)                         # free reshape

        lens2 = jnp.asarray(lens_p.reshape(-1, 1).astype(np.int32))
        rel_feat = bigru_forward(gi, lens2, wh_fused, bh_fused, ts, vmem_limit)
        rel_feat = rel_feat[:n_seq].reshape(train_year, B, num_rel, HIDDEN)
    else:
        gathered = embeddings[years[None, :], idx.T, :]               # (lmax, n_seq, D) f32
        h = mlp_ref(gathered.reshape(lmax * n_seq, D),
                    params['mlp_w1'], params['mlp_b1'],
                    params['mlp_w2'], params['mlp_b2']).reshape(lmax, n_seq, MLP_OUT)
        pos = np.clip(lens[:, None] - 1 - np.arange(lmax)[None, :], 0, lmax - 1)
        h_seq = jnp.transpose(h, (1, 0, 2))
        h_rev = jnp.take_along_axis(h_seq, jnp.asarray(pos.astype(np.int32))[:, :, None],
                                    axis=1)
        lens2 = jnp.asarray(lens.reshape(-1, 1).astype(np.int32))
        rel_feat = bigru_ref(h, jnp.transpose(h_rev, (1, 0, 2)), lens2,
                             params['gru_wif'], params['gru_whf'],
                             params['gru_bif'], params['gru_bhf'],
                             params['gru_wib'], params['gru_whb'],
                             params['gru_bib'], params['gru_bhb'])
        rel_feat = rel_feat.reshape(train_year, B, num_rel, HIDDEN)

    # --- self features: tmp_emb[0] = 0 happens before this index_select --------
    emb_z = embeddings.at[:, 0, :].set(0.0)
    al = jnp.asarray(alignment_list)[input_np]                        # (B, T)
    idxs = jnp.where(al >= 0, al, 0).T                                # (T, B)
    self_feat = emb_z[jnp.arange(train_year)[:, None], idxs, :]       # (T, B, D)

    value = jnp.concatenate([self_feat[:, :, None, :], rel_feat], axis=2)   # (T,B,S,E)
    kv_all = value.reshape(train_year * B, S, E)

    if use_pallas:
        # de-duplicated, pre-scaled query projection (depends only on the batch slot)
        scale = 1.0 / float(np.sqrt(E // NUM_HEADS))
        q_proj = (params['query'].reshape(N_QUERY * B, E) @ params['wq']
                  + params['bq']) * scale
        q_proj = jnp.transpose(q_proj.reshape(N_QUERY, B, E), (1, 0, 2))    # (B, 5, E)

        kv_flat = kv_all.reshape(train_year * B * S, E)
        k_all = (kv_flat @ params['wk'] + params['bk']).astype(jnp.bfloat16)
        v_all = (kv_flat @ params['wv'] + params['bv']).astype(jnp.bfloat16)
        k_all = k_all.reshape(train_year * B, S, E)
        v_all = v_all.reshape(train_year * B, S, E)

        attn_mean = mha_forward(q_proj.astype(jnp.bfloat16), k_all, v_all, B,
                                params['wo'].astype(jnp.bfloat16), params['bo'])
    else:
        q_all = jnp.tile(jnp.transpose(params['query'], (1, 0, 2)),
                         (train_year, 1, 1))                          # (T*B, 5, E)
        attn_mean = mha_mean_ref(q_all, kv_all,
                                 params['wq'], params['bq'], params['wk'], params['bk'],
                                 params['wv'], params['bv'], params['wo'], params['bo'])

    influence = attn_mean.reshape(train_year, B, E)
    influence = influence.reshape(-1, train_year, E)                  # torch.reshape semantics
    return influence


# =============================================================================
# Deterministic parameter init (synthetic; shapes follow the module __init__)
# =============================================================================
def init_params(key, graph_emb, infl_emb, batch_size):
    ks = jax.random.split(key, 18)

    def xavier(k, shape):
        lim = float(np.sqrt(6.0 / (shape[0] + shape[1])))
        return jax.random.uniform(k, shape, jnp.float32, -lim, lim)

    def unif(k, shape, a=0.1):
        return jax.random.uniform(k, shape, jnp.float32, -a, a)

    H3 = 3 * GRU_H
    return dict(
        mlp_w1=xavier(ks[0], (graph_emb, MLP_HID)),
        mlp_b1=unif(ks[1], (1, MLP_HID)),
        mlp_w2=xavier(ks[2], (MLP_HID, MLP_OUT)),
        mlp_b2=unif(ks[3], (1, MLP_OUT)),
        gru_wif=unif(ks[4], (MLP_OUT, H3)),
        gru_whf=unif(ks[5], (GRU_H, H3)),
        gru_bif=unif(ks[6], (1, H3)),
        gru_bhf=unif(ks[7], (1, H3)),
        gru_wib=unif(ks[8], (MLP_OUT, H3)),
        gru_whb=unif(ks[9], (GRU_H, H3)),
        gru_bib=unif(ks[10], (1, H3)),
        gru_bhb=unif(ks[11], (1, H3)),
        wq=xavier(ks[12], (infl_emb, infl_emb)),
        wk=xavier(ks[13], (infl_emb, infl_emb)),
        wv=xavier(ks[14], (infl_emb, infl_emb)),
        wo=xavier(ks[15], (infl_emb, infl_emb)),
        bq=jnp.zeros((1, infl_emb), jnp.float32),
        bk=jnp.zeros((1, infl_emb), jnp.float32),
        bv=jnp.zeros((1, infl_emb), jnp.float32),
        bo=jnp.zeros((1, infl_emb), jnp.float32),
        query=xavier(ks[16], (N_QUERY * batch_size, infl_emb)
                     ).reshape(N_QUERY, batch_size, infl_emb),
    )


def _make_synthetic_inputs(train_year, num_rel, batch, n_nodes, seed):
    key = jax.random.PRNGKey(seed)
    k_emb, k_par = jax.random.split(key)
    embeddings = jax.random.normal(k_emb, (train_year, n_nodes, GRAPH_EMB),
                                   jnp.float32) * 0.5
    params = init_params(k_par, GRAPH_EMB, INFL_EMB, batch)

    # deterministic synthetic index_list[i][j][node] -> variable-length neighbour list
    index_list = []
    for i in range(train_year):
        rel_lists = []
        for j in range(num_rel):
            node_lists = []
            for n in range(n_nodes):
                L = (n + i + 2 * j) % 5                      # 0..4 (some empty lists)
                node_lists.append([(n + k * (j + 1) + i) % n_nodes for k in range(L)])
            rel_lists.append(node_lists)
        index_list.append(rel_lists)

    input_ids = ((np.arange(batch) * 7 + 3) % n_nodes).astype(np.int32)
    alignment_list = np.array(
        [[(n + i) % n_nodes if (n + i) % 3 != 0 else -1 for i in range(train_year)]
         for n in range(n_nodes)], np.int32)
    return embeddings, params, index_list, input_ids, alignment_list


def _run_case(train_year, num_rel, batch, n_nodes, seed=0):
    emb, params, index_list, input_ids, alignment = _make_synthetic_inputs(
        train_year, num_rel, batch, n_nodes, seed)
    out = model_forward(params, emb, index_list, input_ids, alignment,
                        train_year, num_rel, use_pallas=True)
    out = jax.block_until_ready(out)
    ref = model_forward(params, emb, index_list, input_ids, alignment,
                        train_year, num_rel, use_pallas=False)
    ref = jax.block_until_ready(ref)
    assert out.shape == (batch, train_year, INFL_EMB), out.shape
    # bf16 streamed operands / folded weights / approx reciprocals -> loosened tol.
    np.testing.assert_allclose(np.asarray(out), np.asarray(ref), rtol=4e-2, atol=4e-2)


if __name__ == "__main__":
    # small config matching the module defaults (odd batch -> tiled-q fallback path)
    _run_case(train_year=2, num_rel=2, batch=2, n_nodes=12, seed=0)
    # batch divisible by 8 -> shared-q index_map path + multi-step parallel grids
    _run_case(train_year=2, num_rel=3, batch=8, n_nodes=24, seed=1)
    print("KERNEL_OK")
</pallas_src>

<mosaic_0001>
module attributes {stable_mosaic.version = 11 : i64} {
  func.func @mlp_gates_kernel(%arg0: i32, %arg1: memref<32x128xbf16, #tpu.memory_space<vmem>>, %arg2: memref<128x64xbf16, #tpu.memory_space<vmem>>, %arg3: memref<1x64xf32, #tpu.memory_space<vmem>>, %arg4: memref<64x384xbf16, #tpu.memory_space<vmem>>, %arg5: memref<1x384xf32, #tpu.memory_space<vmem>>, %arg6: memref<32x384xbf16, #tpu.memory_space<vmem>>) attributes {dimension_semantics = [#tpu.dimension_semantics<parallel>], iteration_bounds = array<i64: 1>, scalar_prefetch = 0 : i64, scratch_operands = 0 : i64, tpu.core_type = #tpu.core_type<tc>, window_params = [{transform_indices = @transform_0, window_bounds = array<i64: 32, 128>}, {pipeline_mode = #tpu.pipeline_mode<synchronous>, transform_indices = @transform_1, window_bounds = array<i64: 128, 64>}, {pipeline_mode = #tpu.pipeline_mode<synchronous>, transform_indices = @transform_2, window_bounds = array<i64: 1, 64>}, {pipeline_mode = #tpu.pipeline_mode<synchronous>, transform_indices = @transform_3, window_bounds = array<i64: 64, 384>}, {pipeline_mode = #tpu.pipeline_mode<synchronous>, transform_indices = @transform_4, window_bounds = array<i64: 1, 384>}, {transform_indices = @transform_5, window_bounds = array<i64: 32, 384>}]} {
    %c0 = arith.constant 0 : index
    %c0_0 = arith.constant 0 : index
    %0 = vector.load %arg1[%c0, %c0_0] : memref<32x128xbf16, #tpu.memory_space<vmem>>, vector<32x128xbf16>
    %c0_1 = arith.constant 0 : index
    %c0_2 = arith.constant 0 : index
    %1 = vector.load %arg2[%c0_1, %c0_2] : memref<128x64xbf16, #tpu.memory_space<vmem>>, vector<128x64xbf16>
    %cst = arith.constant dense<0.000000e+00> : vector<32x64xf32>
    %2 = tpu.matmul %0, %1, %cst {dimension_numbers = #tpu.dot_dimension_numbers<[1], [0], [0], [1], [0, 0, 1, 1], [], []>} : vector<32x128xbf16>, vector<128x64xbf16>, vector<32x64xf32> -> vector<32x64xf32>
    %c0_3 = arith.constant 0 : index
    %c0_4 = arith.constant 0 : index
    %3 = vector.load %arg3[%c0_3, %c0_4] : memref<1x64xf32, #tpu.memory_space<vmem>>, vector<1x64xf32>
    %4 = vector.broadcast %3 : vector<1x64xf32> to vector<32x64xf32>
    %5 = arith.addf %2, %4 : vector<32x64xf32>
    %cst_5 = arith.constant 0.000000e+00 : f32
    %6 = vector.broadcast %cst_5 : f32 to vector<32x64xf32>
    %7 = arith.maximumf %5, %6 : vector<32x64xf32>
    %8 = arith.truncf %7 : vector<32x64xf32> to vector<32x64xbf16>
    %c0_6 = arith.constant 0 : index
    %c0_7 = arith.constant 0 : index
    %9 = vector.load %arg4[%c0_6, %c0_7] : memref<64x384xbf16, #tpu.memory_space<vmem>>, vector<64x384xbf16>
    %cst_8 = arith.constant dense<0.000000e+00> : vector<32x384xf32>
    %10 = tpu.matmul %8, %9, %cst_8 {dimension_numbers = #tpu.dot_dimension_numbers<[1], [0], [0], [1], [0, 0, 1, 1], [], []>} : vector<32x64xbf16>, vector<64x384xbf16>, vector<32x384xf32> -> vector<32x384xf32>
    %c0_9 = arith.constant 0 : index
    %c0_10 = arith.constant 0 : index
    %11 = vector.load %arg5[%c0_9, %c0_10] : memref<1x384xf32, #tpu.memory_space<vmem>>, vector<1x384xf32>
    %12 = vector.broadcast %11 : vector<1x384xf32> to vector<32x384xf32>
    %13 = arith.addf %10, %12 : vector<32x384xf32>
    %14 = arith.truncf %13 : vector<32x384xf32> to vector<32x384xbf16>
    %c0_11 = arith.constant 0 : index
    %c0_12 = arith.constant 0 : index
    %15 = vector.load %arg6[%c0_11, %c0_12] : memref<32x384xbf16, #tpu.memory_space<vmem>>, vector<32x384xbf16>
    tpu.vector_store %arg6[%c0_11, %c0_12], %14 {strides = array<i32>} : memref<32x384xbf16, #tpu.memory_space<vmem>>, vector<32x384xbf16>,
    return
  }
  func.func @transform_0(%arg0: i32) -> (i32, i32) {
    %c0_i32 = arith.constant 0 : i32
    %c0_i32_0 = arith.constant 0 : i32
    return %arg0, %c0_i32 : i32, i32
  }
  func.func @transform_1(%arg0: i32) -> (i32, i32) {
    %c0_i32 = arith.constant 0 : i32
    %c0_i32_0 = arith.constant 0 : i32
    %c0_i32_1 = arith.constant 0 : i32
    return %c0_i32, %c0_i32_0 : i32, i32
  }
  func.func @transform_2(%arg0: i32) -> (i32, i32) {
    %c0_i32 = arith.constant 0 : i32
    %c0_i32_0 = arith.constant 0 : i32
    %c0_i32_1 = arith.constant 0 : i32
    return %c0_i32, %c0_i32_0 : i32, i32
  }
  func.func @transform_3(%arg0: i32) -> (i32, i32) {
    %c0_i32 = arith.constant 0 : i32
    %c0_i32_0 = arith.constant 0 : i32
    %c0_i32_1 = arith.constant 0 : i32
    return %c0_i32, %c0_i32_0 : i32, i32
  }
  func.func @transform_4(%arg0: i32) -> (i32, i32) {
    %c0_i32 = arith.constant 0 : i32
    %c0_i32_0 = arith.constant 0 : i32
    %c0_i32_1 = arith.constant 0 : i32
    return %c0_i32, %c0_i32_0 : i32, i32
  }
  func.func @transform_5(%arg0: i32) -> (i32, i32) {
    %c0_i32 = arith.constant 0 : i32
    %c0_i32_0 = arith.constant 0 : i32
    return %arg0, %c0_i32 : i32, i32
  }
}

</mosaic_0001>

<bundles_post_ra>
// kernel: tpu_custom_call.1
= control target key start
LH: loop header
LB: loop body
LE: loop exit
PB: predicated region body
PF: predicated region fallthrough
CT: control target
= control target key end

     0   :  { %10 = vsyncpa [#allocation3], 0  ;;  %s696_s0 = inlined_call_operand.hbm [shape: bf16[32,128], index: 0, kind: input, shape index: {}]   ;;  %s697_s1 = inlined_call_operand.vmem [shape: bf16[128,64], index: 1, kind: input, shape index: {}]   ;;  %s698_s2 = inlined_call_operand.hbm [shape: f32[1,64], index: 2, kind: input, shape index: {}]   ;;  %s699_s3 = inlined_call_operand.vmem [shape: bf16[64,384], index: 3, kind: input, shape index: {}]   ;;  %s700_s4 = inlined_call_operand.vmem [shape: f32[1,384], index: 4, kind: input, shape index: {}]   ;;  %s701_s5 = inlined_call_operand.hbm [shape: bf16[32,384], index: 5, kind: output, shape index: {}]  }
   0x1   :  { %11 = vsyncpa [#allocation6], 0 }
   0x2   :  { %12 = vsyncpa [#allocation4], 0  ;;  %s17_s20 = sshll.u32 %s696_s0, 4  ;;  %s551_s21 = smov [#allocation2]   ;;  %s18_s20 = int_to_ptr.hbm [resolvable:$true] %s17_s20 }
   0x3   :  { %s19_s22 = sshll.u32 %s551_s21, 4  ;;  %s33_s25 = sshll.u32 %s698_s2, 4  ;;  %s20_s22 = int_to_ptr.vmem [resolvable:$true] %s19_s22  ;;  %s34_s25 = int_to_ptr.hbm [resolvable:$true] %s33_s25 }
   0x4   :  { %s552_s26 = smov 64   ;;  %s553_s27 = smov 4  }
   0x5   :  { %25 = dma.hbm_to_vmem [thread:$0]  %s18_s20, 256, %s20_s22, [#allocation3], %s552_s26, %s552_s26, %s553_s27  }
   0x6   :  { %s554_s28 = smov [#allocation5]  }
   0x7   :  { %s35_s29 = sshll.u32 %s554_s28, 4  ;;  %s36_s29 = int_to_ptr.vmem [resolvable:$true] %s35_s29 }
   0x8   :  { %38 = dma.hbm_to_vmem [thread:$0]  %s34_s25, 16, %s36_s29, [#allocation6]  }
   0x9   :  { %545 = dma.done.wait [#allocation3], 256  }
   0xa   :  { %546 = vsyncadd [#allocation3], 4294967040 }
   0xb   :  { %547 = dma.done.wait [#allocation6], 16  }
   0xc   :  { %548 = vsyncadd [#allocation6], 4294967280  ;;  %v452_v0 = vld [vmem:[%s697_s1 + $0x38] sm:$0xff]  ;;  %v451_v1 = vld [vmem:[%s697_s1 + $0x30] sm:$0xff]  ;;  %vm249_vm0 = vcmask 523264   ;;  %s335_s15 = sshll.u32 %s701_s5, 4  ;;  %s336_s15 = int_to_ptr.hbm [resolvable:$true] %s335_s15 }
   0xd   :  { %136 = vmatpush.bf16.msra.mxu0 %v452_v0  ;;  %v450_v2 = vld [vmem:[%s697_s1 + $0x28] sm:$0xff]  ;;  %v449_v3 = vld [vmem:[%s697_s1 + $0x20] sm:$0xff]  ;;  %v448_v4 = vld [vmem:[%s697_s1 + $0x18] sm:$0xff]  ;;  %s556_s16 = smov 192   ;;  %s557_s17 = smov 12  }
   0xe   :  { %v447_v5 = vld [vmem:[%s697_s1 + $0x10] sm:$0xff]  ;;  %v446_v6 = vld [vmem:[%s697_s1 + $0x8] sm:$0xff]  ;;  %v445_v7 = vld [vmem:[%s697_s1] sm:$0xff] }
   0xf   :  { %v443_v8 = vld [vmem:[#allocation2] sm:$0xff]  ;;  %v444_v9 = vld [vmem:[#allocation2 + $0x8] sm:$0xff]  ;;  %v463_v11 = vld [vmem:[%s699_s3 + $0x50] sm:$0xf0] }
  0x10   :  { %v427_v10 = vld [vmem:[%s699_s3 + $0x48] sm:$0xf]  ;;  %v462_v12 = vld [vmem:[%s699_s3 + $0x4c] sm:$0xf]  ;;  %v429_v14 = vld [vmem:[%s699_s3 + $0x54] sm:$0xf0] }
  0x11   :  { %137 = vmatpush.bf16.msra.mxu0 %v451_v1  ;;  %v428_v13 = vor.u32 %v463_v11, %v427_v10  ;;  %v435_v15 = vld [vmem:[%s699_s3 + $0x50] sm:$0xf]  ;;  %v464_v16 = vld [vmem:[%s699_s3 + $0x58] sm:$0xf0]  ;;  %v432_v17 = vor.u32 %v462_v12, %v429_v14  ;;  %v459_v21 = vld [vmem:[%s699_s3 + $0x34] sm:$0xf] }
  0x12   :  { %v436_v18 = vor.u32 %v464_v16, %v435_v15  ;;  %v415_v19 = vld [vmem:[%s699_s3 + $0x30] sm:$0xf]  ;;  %v460_v20 = vld [vmem:[%s699_s3 + $0x38] sm:$0xf0]  ;;  %v417_v23 = vld [vmem:[%s699_s3 + $0x3c] sm:$0xf0] }
  0x13   :  { %260 = vmatpush.bf16.msra.mxu1 %v428_v13  ;;  %279 = vmatpush.bf16.msra.mxu2 %v432_v17  ;;  %v416_v22 = vor.u32 %v460_v20, %v415_v19  ;;  %v423_v24 = vld [vmem:[%s699_s3 + $0x38] sm:$0xf]  ;;  %v461_v25 = vld [vmem:[%s699_s3 + $0x40] sm:$0xf0]  ;;  %v420_v26 = vor.u32 %v459_v21, %v417_v23  ;;  %v456_v30 = vld [vmem:[%s699_s3 + $0x1c] sm:$0xf] }
  0x14   :  { %298 = vmatpush.bf16.msra.mxu3 %v436_v18  ;;  %v424_v27 = vor.u32 %v461_v25, %v423_v24  ;;  %v403_v28 = vld [vmem:[%s699_s3 + $0x18] sm:$0xf]  ;;  %v457_v29 = vld [vmem:[%s699_s3 + $0x20] sm:$0xf0]  ;;  %v405_v32 = vld [vmem:[%s699_s3 + $0x24] sm:$0xf0] }
  0x15   :  { %138 = vmatpush.bf16.msra.mxu0 %v450_v2  ;;  %v404_v31 = vor.u32 %v457_v29, %v403_v28  ;;  %v411_v33 = vld [vmem:[%s699_s3 + $0x20] sm:$0xf]  ;;  %v458_v34 = vld [vmem:[%s699_s3 + $0x28] sm:$0xf0]  ;;  %v408_v35 = vor.u32 %v456_v30, %v405_v32  ;;  %v453_v39 = vld [vmem:[%s699_s3 + $0x4] sm:$0xf] }
  0x16   :  { %v412_v36 = vor.u32 %v458_v34, %v411_v33  ;;  %v391_v37 = vld [vmem:[%s699_s3] sm:$0xf]  ;;  %v454_v38 = vld [vmem:[%s699_s3 + $0x8] sm:$0xf0]  ;;  %v393_v41 = vld [vmem:[%s699_s3 + $0xc] sm:$0xf0] }
  0x17   :  { %261 = vmatpush.bf16.msra.mxu1 %v416_v22  ;;  %280 = vmatpush.bf16.msra.mxu2 %v420_v26  ;;  %v392_v40 = vor.u32 %v454_v38, %v391_v37  ;;  %v399_v42 = vld [vmem:[%s699_s3 + $0x8] sm:$0xf]  ;;  %v455_v43 = vld [vmem:[%s699_s3 + $0x10] sm:$0xf0]  ;;  %v396_v44 = vor.u32 %v453_v39, %v393_v41  ;;  %v472_v47 = vld [vmem:[#allocation5] ss:$0 sm:$0xff] }
  0x18   :  { %299 = vmatpush.bf16.msra.mxu3 %v424_v27  ;;  %v400_v45 = vor.u32 %v455_v43, %v399_v42  ;;  %v177_v61 = vld [vmem:[%s700_s4] sm:$0x7]  ;;  %s555_s4 = smov [#allocation7]  }
  0x19   :  { %139 = vmatpush.bf16.msra.mxu0 %v449_v3  ;;  %v179_v63 = vperm.slane %v177_v61, 0  ;;  %v180_v0 = vperm.slane %v177_v61, 1  ;;  %v181_v1 = vperm.slane %v177_v61, 2  ;;  %s333_s12 = sshll.u32 %s555_s4, 4  ;;  %s334_s12 = int_to_ptr.vmem [resolvable:$true] %s333_s12 }
  0x1b   :  { %262 = vmatpush.bf16.msra.mxu1 %v404_v31  ;;  %281 = vmatpush.bf16.msra.mxu2 %v408_v35 }
  0x1c   :  { %300 = vmatpush.bf16.msra.mxu3 %v412_v36 }
  0x1d   :  { %140 = vmatpush.bf16.msra.mxu0 %v448_v4 }
  0x1f   :  { %263 = vmatpush.bf16.msra.mxu1 %v392_v40  ;;  %282 = vmatpush.bf16.msra.mxu2 %v396_v44 }
  0x20   :  { %301 = vmatpush.bf16.msra.mxu3 %v400_v45 }
  0x21   :  { %141 = vmatpush.bf16.msra.mxu0 %v447_v5 }
  0x25   :  { %142 = vmatpush.bf16.msra.mxu0 %v446_v6 }
  0x29   :  { %143 = vmatpush.bf16.msra.mxu0 %v445_v7 }
  0x2c   :  { %144 = vmatmul.bf16.vlgmr.msra.gmra.mxu0 %v443_v8 }
  0x3c   :  { %149 = vmatmul.bf16.gmra.mxu0 %v444_v9 }
  0xa9   :  { %v145_v46 = vpop.f32.mrf.mxu0 }
  0xaa   :  { %v146_v48 = vadd.f32 %v472_v47, %v145_v46 }
  0xac   :  { %v155_v51 = vmax.f32 %v146_v48, 0.0 }
  0xb1   :  { %v147_v49 = vpop.f32.mrf.mxu0 }
  0xb2   :  { %v148_v50 = vadd.f32 %v472_v47, %v147_v49 }
  0xb4   :  { %v156_v52 = vmax.f32 %v148_v50, 0.0 }
  0xb6   :  { %v159_v53 = vpack.c.bf16 %v156_v52, %v155_v51 }
  0xb8   :  { %437 = vmatmul.msk.bf16.vlgmr.msra.gmra.mxu1 %vm249_vm0, %v159_v53  ;;  %439 = vmatmul.msk.bf16.vlgmr.msra.gmra.mxu2 %vm249_vm0, %v159_v53 }
  0xb9   :  { %441 = vmatmul.msk.bf16.vlgmr.msra.gmra.mxu3 %vm249_vm0, %v159_v53  ;;  %v150_v54 = vpop.f32.mrf.mxu0 }
  0xba   :  { %v151_v55 = vadd.f32 %v472_v47, %v150_v54 }
  0xbc   :  { %v157_v58 = vmax.f32 %v151_v55, 0.0 }
  0xc1   :  { %v152_v56 = vpop.f32.mrf.mxu0 }
  0xc2   :  { %v153_v57 = vadd.f32 %v472_v47, %v152_v56 }
  0xc4   :  { %v158_v59 = vmax.f32 %v153_v57, 0.0 }
  0xc6   :  { %v160_v60 = vpack.c.bf16 %v158_v59, %v157_v58 }
  0xc8   :  { %438 = vmatmul.msk.bf16.gmra.mxu1 %vm249_vm0, %v160_v60  ;;  %440 = vmatmul.msk.bf16.gmra.mxu2 %vm249_vm0, %v160_v60 }
  0xc9   :  { %442 = vmatmul.msk.bf16.gmra.mxu3 %vm249_vm0, %v160_v60 }
 0x135   :  { %v265_v62 = vpop.f32.mrf.mxu1 }
 0x136   :  { %v266_v3 = vadd.f32 %v265_v62, %v179_v63 }
 0x13b   :  { %v284_v2 = vpop.f32.mrf.mxu2 }
 0x13c   :  { %v285_v4 = vadd.f32 %v284_v2, %v180_v0  ;;  %v303_v5 = vpop.f32.mrf.mxu3 }
 0x13d   :  { %v304_v6 = vadd.f32 %v303_v5, %v181_v1  ;;  %v267_v7 = vpop.f32.mrf.mxu1 }
 0x13e   :  { %v313_v8 = vpack.c.bf16 %v285_v4, %v266_v3  ;;  %v268_v11 = vadd.f32 %v267_v7, %v179_v63 }
 0x13f   :  { %v314_v9 = vpack.c.bf16 %v304_v6, %v304_v6 }
 0x140   :  { %321 = vst [vmem:[#allocation7] sm:$0xff] %v313_v8 }
 0x141   :  { %322 = vst [vmem:[#allocation7 + $0x8] sm:$0xf] %v314_v9 }
 0x143   :  { %v286_v10 = vpop.f32.mrf.mxu2 }
 0x144   :  { %v287_v12 = vadd.f32 %v286_v10, %v180_v0  ;;  %v305_v13 = vpop.f32.mrf.mxu3 }
 0x145   :  { %v306_v14 = vadd.f32 %v305_v13, %v181_v1  ;;  %v270_v17 = vpop.f32.mrf.mxu1 }
 0x146   :  { %v315_v15 = vpack.c.bf16 %v287_v12, %v268_v11  ;;  %v271_v19 = vadd.f32 %v270_v17, %v179_v63 }
 0x147   :  { %v316_v16 = vpack.c.bf16 %v306_v14, %v306_v14 }
 0x148   :  { %323 = vst [vmem:[#allocation7 + $0xc] sm:$0xff] %v315_v15 }
 0x149   :  { %324 = vst [vmem:[#allocation7 + $0x14] sm:$0xf] %v316_v16 }
 0x14b   :  { %v289_v18 = vpop.f32.mrf.mxu2 }
 0x14c   :  { %v290_v20 = vadd.f32 %v289_v18, %v180_v0  ;;  %v308_v21 = vpop.f32.mrf.mxu3 }
 0x14d   :  { %v309_v22 = vadd.f32 %v308_v21, %v181_v1  ;;  %v272_v25 = vpop.f32.mrf.mxu1 }
 0x14e   :  { %v317_v23 = vpack.c.bf16 %v290_v20, %v271_v19  ;;  %v273_v27 = vadd.f32 %v272_v25, %v179_v63 }
 0x14f   :  { %v318_v24 = vpack.c.bf16 %v309_v22, %v309_v22 }
 0x150   :  { %325 = vst [vmem:[#allocation7 + $0x18] sm:$0xff] %v317_v23 }
 0x151   :  { %326 = vst [vmem:[#allocation7 + $0x20] sm:$0xf] %v318_v24 }
 0x153   :  { %v291_v26 = vpop.f32.mrf.mxu2 }
 0x154   :  { %v292_v28 = vadd.f32 %v291_v26, %v180_v0  ;;  %v310_v29 = vpop.f32.mrf.mxu3 }
 0x155   :  { %v311_v30 = vadd.f32 %v310_v29, %v181_v1 }
 0x156   :  { %v319_v31 = vpack.c.bf16 %v292_v28, %v273_v27 }
 0x157   :  { %v320_v32 = vpack.c.bf16 %v311_v30, %v311_v30 }
 0x158   :  { %327 = vst [vmem:[#allocation7 + $0x24] sm:$0xff] %v319_v31 }
 0x159   :  { %328 = vst [vmem:[#allocation7 + $0x2c] sm:$0xf] %v320_v32 }
 0x15a   :  { %341 = dma.vmem_to_hbm [thread:$0]  %s334_s12, 768, %s336_s15, [#allocation4], %s556_s16, %s556_s16, %s557_s17  }
 0x15b   :  { %549 = dma.done.wait [#allocation4], 768  }
 0x15c   :  { %550 = vsyncadd [#allocation4], 4294966528 }
 0x15d   :  { %346 = vsyncpa [#allocation3], 1 }
 0x15e   :  { %347 = vsyncpa [#allocation6], 1 }
 0x15f   :  { %348 = vsyncpa [#allocation4], 1 }

</bundles_post_ra>
